<compile_context>
chip_gen: v5e
topology: v5e:2x2
jax: 0.10.0
libtpu: 0.0.40
codegen_flags: <defaults>
</compile_context>

<pallas_src>
import jax
import jax.numpy as jnp
from jax.experimental import pallas as pl
from jax.experimental.pallas import tpu as pltpu

HIDDEN = 256
LN_EPS = 1e-5


def _round_up(x, m):
    return (x + m - 1) // m * m


def _layernorm_f32(x, gamma, beta):
    # Centered two-pass statistics (matches PyTorch LayerNorm, biased var),
    # all math in f32.  Two lane-reductions per call (sum, sum of squares of
    # the centered values) -> same XLU traffic as the single-pass form but
    # without the E[x^2]-E[x]^2 cancellation hazard.
    n = x.shape[-1]
    mean = jnp.sum(x, axis=-1, keepdims=True) * (1.0 / n)
    xc = x - mean
    var = jnp.sum(xc * xc, axis=-1, keepdims=True) * (1.0 / n)
    inv = jax.lax.rsqrt(var + LN_EPS)
    return xc * inv * gamma + beta


def critic_kernel(sa_ref,
                  w1_ref, b1_ref, g1_ref, be1_ref,
                  w2_ref, b2_ref, g2_ref, be2_ref,
                  wq1_ref, wq2_ref, bq_ref,
                  q_ref):
    # layer 1: single merged-K Linear -> LayerNorm -> ReLU
    h = jnp.dot(sa_ref[...], w1_ref[...],
                preferred_element_type=jnp.float32) + b1_ref[...]
    h = _layernorm_f32(h, g1_ref[...], be1_ref[...])
    h = jnp.maximum(h, 0.0)

    # layer 2: Linear -> LayerNorm -> ReLU (bf16 operands, f32 MXU accumulate)
    h = jnp.dot(h.astype(jnp.bfloat16), w2_ref[...],
                preferred_element_type=jnp.float32) + b2_ref[...]
    h = _layernorm_f32(h, g2_ref[...], be2_ref[...])
    h = jnp.maximum(h, 0.0)

    # twin Q heads on VPU + XLU (no N=2 MXU push): q_k = sum(h * wq_k) + bq_k
    q1 = jnp.sum(h * wq1_ref[...], axis=-1, keepdims=True)   # (TB, 1)
    q2 = jnp.sum(h * wq2_ref[...], axis=-1, keepdims=True)   # (TB, 1)
    lane = jax.lax.broadcasted_iota(jnp.int32, (h.shape[0], 2), 1)
    q_ref[...] = jnp.where(lane == 0, q1, q2) + bq_ref[...]


def prepare_params(params):
    """One-time parameter prep (cache per train step, NOT per forward call)."""
    return dict(
        w1=params["w1"].astype(jnp.bfloat16),                        # (d_in, 256)
        w2=params["w2"].astype(jnp.bfloat16),                        # (256, 256)
        b1=params["b1"].reshape(1, HIDDEN).astype(jnp.float32),
        g1=params["g1"].reshape(1, HIDDEN).astype(jnp.float32),
        be1=params["be1"].reshape(1, HIDDEN).astype(jnp.float32),
        b2=params["b2"].reshape(1, HIDDEN).astype(jnp.float32),
        g2=params["g2"].reshape(1, HIDDEN).astype(jnp.float32),
        be2=params["be2"].reshape(1, HIDDEN).astype(jnp.float32),
        wq1=params["wq1"].reshape(1, HIDDEN).astype(jnp.float32),    # row form for VPU head
        wq2=params["wq2"].reshape(1, HIDDEN).astype(jnp.float32),
        bq=jnp.concatenate([params["bq1"], params["bq2"]]).reshape(1, 2).astype(jnp.float32),
    )


def critic_forward(s, a, prepped, block_batch=1024):
    B, state_dim = s.shape
    action_dim = a.shape[1]
    d_in = state_dim + action_dim

    # ---- batch tile selection ----------------------------------------------
    # Aim for >= ~4 grid steps (both v7x TensorCores get work; per-step
    # overhead ~0.35us amortized), capped by block_batch and the actual batch.
    block_batch = max(8, (block_batch // 8) * 8)
    TB = min(block_batch, _round_up(B, 8), _round_up(pl.cdiv(B, 4), 128))
    Bp = _round_up(B, TB)
    grid = (Bp // TB,)

    # ---- input prep: fuse the concat with the bf16 cast; pad only the tail --
    sa = jnp.concatenate([s, a], axis=1).astype(jnp.bfloat16)
    if Bp != B:
        sa = jnp.pad(sa, ((0, Bp - B), (0, 0)))

    # activation tiles iterate over batch; parameters stay VMEM-resident
    def batch_map(i):
        return (i, 0)

    def param_map(i):
        return (0, 0)

    in_specs = [
        pl.BlockSpec((TB, d_in), batch_map),
        pl.BlockSpec((d_in, HIDDEN), param_map),
        pl.BlockSpec((1, HIDDEN), param_map),
        pl.BlockSpec((1, HIDDEN), param_map),
        pl.BlockSpec((1, HIDDEN), param_map),
        pl.BlockSpec((HIDDEN, HIDDEN), param_map),
        pl.BlockSpec((1, HIDDEN), param_map),
        pl.BlockSpec((1, HIDDEN), param_map),
        pl.BlockSpec((1, HIDDEN), param_map),
        pl.BlockSpec((1, HIDDEN), param_map),
        pl.BlockSpec((1, HIDDEN), param_map),
        pl.BlockSpec((1, 2), param_map),
    ]
    out_specs = pl.BlockSpec((TB, 2), batch_map)

    # ---- cost estimate & VMEM budget ----------------------------------------
    weight_bytes = (d_in * HIDDEN + HIDDEN * HIDDEN) * 2 + (8 * HIDDEN + 2) * 4
    cost = pl.CostEstimate(
        flops=2 * Bp * (d_in * HIDDEN + HIDDEN * HIDDEN + 2 * HIDDEN),
        transcendentals=2 * Bp,                      # one rsqrt per row per LN
        bytes_accessed=Bp * d_in * 2 + Bp * 2 * 4 + weight_bytes,
    )
    # Explicit VMEM limit sized to the tile: double-buffered IO + resident
    # params + generous allowance for f32 intermediates, with headroom.
    # Capped below v7x's 64 MiB physical per-core VMEM.
    io_bytes = 2 * (TB * d_in * 2 + TB * 2 * 4)
    temp_bytes = 8 * TB * HIDDEN * 4
    vmem_limit = int(min(weight_bytes + io_bytes + temp_bytes + (16 << 20), 48 << 20))

    q = pl.pallas_call(
        critic_kernel,
        out_shape=jax.ShapeDtypeStruct((Bp, 2), jnp.float32),
        grid=grid,
        in_specs=in_specs,
        out_specs=out_specs,
        compiler_params=pltpu.CompilerParams(
            dimension_semantics=("parallel",),
            vmem_limit_bytes=vmem_limit,
        ),
        cost_estimate=cost,
    )(sa,
      prepped["w1"], prepped["b1"], prepped["g1"], prepped["be1"],
      prepped["w2"], prepped["b2"], prepped["g2"], prepped["be2"],
      prepped["wq1"], prepped["wq2"], prepped["bq"])

    return q[:B, 0:1], q[:B, 1:2]


# ------------------------- deterministic parameter init ----------------------

def _orthogonal(key, out_dim, in_dim, gain):
    # matches nn.init.orthogonal_ semantics (PyTorch weight shape (out, in))
    a = jax.random.normal(key, (max(out_dim, in_dim), min(out_dim, in_dim)),
                          dtype=jnp.float32)
    q, r = jnp.linalg.qr(a)
    q = q * jnp.sign(jnp.diagonal(r))
    if out_dim < in_dim:
        q = q.T
    return (gain * q[:out_dim, :in_dim]).astype(jnp.float32)


def init_params(key, state_dim_all, action_dim):
    d_in = state_dim_all + action_dim
    ks = jax.random.split(key, 8)
    gain = jnp.sqrt(2.0)

    # shared_net linears: orthogonal weight, zero bias (stored as (in, out))
    w1 = _orthogonal(ks[0], HIDDEN, d_in, gain).T          # (d_in, 256)
    b1 = jnp.zeros((HIDDEN,), jnp.float32)
    w2 = _orthogonal(ks[1], HIDDEN, HIDDEN, gain).T        # (256, 256)
    b2 = jnp.zeros((HIDDEN,), jnp.float32)

    # LayerNorm affine params (PyTorch defaults: weight=1, bias=0)
    g1 = jnp.ones((HIDDEN,), jnp.float32)
    be1 = jnp.zeros((HIDDEN,), jnp.float32)
    g2 = jnp.ones((HIDDEN,), jnp.float32)
    be2 = jnp.zeros((HIDDEN,), jnp.float32)

    # Q heads: weight ~ U(-0.003, 0.003); bias keeps default U(-1/sqrt(fan_in), ...)
    bound = 1.0 / jnp.sqrt(jnp.float32(HIDDEN))
    wq1 = jax.random.uniform(ks[2], (HIDDEN, 1), jnp.float32, -0.003, 0.003)
    bq1 = jax.random.uniform(ks[3], (1,), jnp.float32, -bound, bound)
    wq2 = jax.random.uniform(ks[4], (HIDDEN, 1), jnp.float32, -0.003, 0.003)
    bq2 = jax.random.uniform(ks[5], (1,), jnp.float32, -bound, bound)

    return dict(w1=w1, b1=b1, g1=g1, be1=be1,
                w2=w2, b2=b2, g2=g2, be2=be2,
                wq1=wq1, bq1=bq1, wq2=wq2, bq2=bq2)


# ------------------------------- pure-JAX reference ---------------------------

def _layernorm_ref(x, gamma, beta):
    mean = jnp.mean(x, axis=-1, keepdims=True)
    var = jnp.mean((x - mean) ** 2, axis=-1, keepdims=True)
    return (x - mean) * jax.lax.rsqrt(var + LN_EPS) * gamma + beta


def critic_ref(s, a, p):
    sa = jnp.concatenate([s, a], axis=1).astype(jnp.float32)
    h = sa @ p["w1"] + p["b1"]
    h = _layernorm_ref(h, p["g1"], p["be1"])
    h = jnp.maximum(h, 0.0)
    h = h @ p["w2"] + p["b2"]
    h = _layernorm_ref(h, p["g2"], p["be2"])
    h = jnp.maximum(h, 0.0)
    return h @ p["wq1"] + p["bq1"], h @ p["wq2"] + p["bq2"]


if __name__ == "__main__":
    key = jax.random.PRNGKey(0)
    k_p, k_s, k_a, k_s2, k_a2 = jax.random.split(key, 5)

    BATCH = 2
    STATE_DIM_ALL = 16
    ACTION_DIM = 8

    params = init_params(k_p, STATE_DIM_ALL, ACTION_DIM)
    prepped = prepare_params(params)          # hoisted prep, reused across calls

    s = jax.random.normal(k_s, (BATCH, STATE_DIM_ALL), jnp.float32)
    a = jax.random.normal(k_a, (BATCH, ACTION_DIM), jnp.float32)

    q1, q2 = critic_forward(s, a, prepped)
    jax.block_until_ready((q1, q2))

    q1_ref, q2_ref = critic_ref(s, a, params)
    assert q1.shape == (BATCH, 1) and q2.shape == (BATCH, 1)
    # bf16 MXU operands with f32 accumulation -> relaxed tolerance vs f32 ref
    assert jnp.allclose(q1, q1_ref, atol=5e-3, rtol=5e-2)
    assert jnp.allclose(q2, q2_ref, atol=5e-3, rtol=5e-2)

    # second check: non-multiple batch + multi-step grid + tail-padding path
    B2 = 300
    s2 = jax.random.normal(k_s2, (B2, STATE_DIM_ALL), jnp.float32)
    a2 = jax.random.normal(k_a2, (B2, ACTION_DIM), jnp.float32)
    q1b, q2b = critic_forward(s2, a2, prepped, block_batch=128)
    jax.block_until_ready((q1b, q2b))
    q1b_ref, q2b_ref = critic_ref(s2, a2, params)
    assert q1b.shape == (B2, 1) and q2b.shape == (B2, 1)
    assert jnp.allclose(q1b, q1b_ref, atol=5e-3, rtol=5e-2)
    assert jnp.allclose(q2b, q2b_ref, atol=5e-3, rtol=5e-2)

    print("KERNEL_OK")
</pallas_src>

<mosaic_0001>
module attributes {stable_mosaic.version = 11 : i64} {
  func.func @critic_kernel(%arg0: i32, %arg1: memref<8x24xbf16, #tpu.memory_space<vmem>>, %arg2: memref<24x256xbf16, #tpu.memory_space<vmem>>, %arg3: memref<1x256xf32, #tpu.memory_space<vmem>>, %arg4: memref<1x256xf32, #tpu.memory_space<vmem>>, %arg5: memref<1x256xf32, #tpu.memory_space<vmem>>, %arg6: memref<256x256xbf16, #tpu.memory_space<vmem>>, %arg7: memref<1x256xf32, #tpu.memory_space<vmem>>, %arg8: memref<1x256xf32, #tpu.memory_space<vmem>>, %arg9: memref<1x256xf32, #tpu.memory_space<vmem>>, %arg10: memref<1x256xf32, #tpu.memory_space<vmem>>, %arg11: memref<1x256xf32, #tpu.memory_space<vmem>>, %arg12: memref<1x2xf32, #tpu.memory_space<vmem>>, %arg13: memref<8x2xf32, #tpu.memory_space<vmem>>) attributes {dimension_semantics = [#tpu.dimension_semantics<parallel>], iteration_bounds = array<i64: 1>, scalar_prefetch = 0 : i64, scratch_operands = 0 : i64, tpu.core_type = #tpu.core_type<tc>, window_params = [{transform_indices = @transform_0, window_bounds = array<i64: 8, 24>}, {pipeline_mode = #tpu.pipeline_mode<synchronous>, transform_indices = @transform_1, window_bounds = array<i64: 24, 256>}, {pipeline_mode = #tpu.pipeline_mode<synchronous>, transform_indices = @transform_2, window_bounds = array<i64: 1, 256>}, {pipeline_mode = #tpu.pipeline_mode<synchronous>, transform_indices = @transform_3, window_bounds = array<i64: 1, 256>}, {pipeline_mode = #tpu.pipeline_mode<synchronous>, transform_indices = @transform_4, window_bounds = array<i64: 1, 256>}, {pipeline_mode = #tpu.pipeline_mode<synchronous>, transform_indices = @transform_5, window_bounds = array<i64: 256, 256>}, {pipeline_mode = #tpu.pipeline_mode<synchronous>, transform_indices = @transform_6, window_bounds = array<i64: 1, 256>}, {pipeline_mode = #tpu.pipeline_mode<synchronous>, transform_indices = @transform_7, window_bounds = array<i64: 1, 256>}, {pipeline_mode = #tpu.pipeline_mode<synchronous>, transform_indices = @transform_8, window_bounds = array<i64: 1, 256>}, {pipeline_mode = #tpu.pipeline_mode<synchronous>, transform_indices = @transform_9, window_bounds = array<i64: 1, 256>}, {pipeline_mode = #tpu.pipeline_mode<synchronous>, transform_indices = @transform_10, window_bounds = array<i64: 1, 256>}, {pipeline_mode = #tpu.pipeline_mode<synchronous>, transform_indices = @transform_11, window_bounds = array<i64: 1, 2>}, {transform_indices = @transform_12, window_bounds = array<i64: 8, 2>}]} {
    %c0 = arith.constant 0 : index
    %c0_0 = arith.constant 0 : index
    %0 = vector.load %arg1[%c0, %c0_0] : memref<8x24xbf16, #tpu.memory_space<vmem>>, vector<8x24xbf16>
    %c0_1 = arith.constant 0 : index
    %c0_2 = arith.constant 0 : index
    %1 = vector.load %arg2[%c0_1, %c0_2] : memref<24x256xbf16, #tpu.memory_space<vmem>>, vector<24x256xbf16>
    %cst = arith.constant dense<0.000000e+00> : vector<8x256xf32>
    %2 = tpu.matmul %0, %1, %cst {dimension_numbers = #tpu.dot_dimension_numbers<[1], [0], [0], [1], [0, 0, 1, 1], [], []>} : vector<8x24xbf16>, vector<24x256xbf16>, vector<8x256xf32> -> vector<8x256xf32>
    %c0_3 = arith.constant 0 : index
    %c0_4 = arith.constant 0 : index
    %3 = vector.load %arg3[%c0_3, %c0_4] : memref<1x256xf32, #tpu.memory_space<vmem>>, vector<1x256xf32>
    %4 = vector.broadcast %3 : vector<1x256xf32> to vector<8x256xf32>
    %5 = arith.addf %2, %4 : vector<8x256xf32>
    %c0_5 = arith.constant 0 : index
    %c0_6 = arith.constant 0 : index
    %6 = vector.load %arg4[%c0_5, %c0_6] : memref<1x256xf32, #tpu.memory_space<vmem>>, vector<1x256xf32>
    %c0_7 = arith.constant 0 : index
    %c0_8 = arith.constant 0 : index
    %7 = vector.load %arg5[%c0_7, %c0_8] : memref<1x256xf32, #tpu.memory_space<vmem>>, vector<1x256xf32>
    %cst_9 = arith.constant dense<0.000000e+00> : vector<8xf32>
    %8 = vector.multi_reduction <add>, %5, %cst_9 [1] : vector<8x256xf32> to vector<8xf32>
    %9 = vector.shape_cast %8 : vector<8xf32> to vector<8x1xf32>
    %cst_10 = arith.constant 3.906250e-03 : f32
    %10 = vector.broadcast %cst_10 : f32 to vector<8x1xf32>
    %11 = arith.mulf %9, %10 : vector<8x1xf32>
    %12 = vector.broadcast %11 : vector<8x1xf32> to vector<8x256xf32>
    %13 = arith.subf %5, %12 : vector<8x256xf32>
    %14 = arith.mulf %13, %13 : vector<8x256xf32>
    %cst_11 = arith.constant dense<0.000000e+00> : vector<8xf32>
    %15 = vector.multi_reduction <add>, %14, %cst_11 [1] : vector<8x256xf32> to vector<8xf32>
    %16 = vector.shape_cast %15 : vector<8xf32> to vector<8x1xf32>
    %cst_12 = arith.constant 3.906250e-03 : f32
    %17 = vector.broadcast %cst_12 : f32 to vector<8x1xf32>
    %18 = arith.mulf %16, %17 : vector<8x1xf32>
    %cst_13 = arith.constant 9.99999974E-6 : f32
    %19 = vector.broadcast %cst_13 : f32 to vector<8x1xf32>
    %20 = arith.addf %18, %19 : vector<8x1xf32>
    %21 = math.rsqrt %20 : vector<8x1xf32>
    %22 = vector.broadcast %21 : vector<8x1xf32> to vector<8x256xf32>
    %23 = arith.mulf %13, %22 : vector<8x256xf32>
    %24 = vector.broadcast %6 : vector<1x256xf32> to vector<8x256xf32>
    %25 = arith.mulf %23, %24 : vector<8x256xf32>
    %26 = vector.broadcast %7 : vector<1x256xf32> to vector<8x256xf32>
    %27 = arith.addf %25, %26 : vector<8x256xf32>
    %cst_14 = arith.constant 0.000000e+00 : f32
    %28 = vector.broadcast %cst_14 : f32 to vector<8x256xf32>
    %29 = arith.maximumf %27, %28 : vector<8x256xf32>
    %30 = arith.truncf %29 : vector<8x256xf32> to vector<8x256xbf16>
    %c0_15 = arith.constant 0 : index
    %c0_16 = arith.constant 0 : index
    %31 = vector.load %arg6[%c0_15, %c0_16] : memref<256x256xbf16, #tpu.memory_space<vmem>>, vector<256x256xbf16>
    %cst_17 = arith.constant dense<0.000000e+00> : vector<8x256xf32>
    %32 = tpu.matmul %30, %31, %cst_17 {dimension_numbers = #tpu.dot_dimension_numbers<[1], [0], [0], [1], [0, 0, 1, 1], [], []>} : vector<8x256xbf16>, vector<256x256xbf16>, vector<8x256xf32> -> vector<8x256xf32>
    %c0_18 = arith.constant 0 : index
    %c0_19 = arith.constant 0 : index
    %33 = vector.load %arg7[%c0_18, %c0_19] : memref<1x256xf32, #tpu.memory_space<vmem>>, vector<1x256xf32>
    %34 = vector.broadcast %33 : vector<1x256xf32> to vector<8x256xf32>
    %35 = arith.addf %32, %34 : vector<8x256xf32>
    %c0_20 = arith.constant 0 : index
    %c0_21 = arith.constant 0 : index
    %36 = vector.load %arg8[%c0_20, %c0_21] : memref<1x256xf32, #tpu.memory_space<vmem>>, vector<1x256xf32>
    %c0_22 = arith.constant 0 : index
    %c0_23 = arith.constant 0 : index
    %37 = vector.load %arg9[%c0_22, %c0_23] : memref<1x256xf32, #tpu.memory_space<vmem>>, vector<1x256xf32>
    %cst_24 = arith.constant dense<0.000000e+00> : vector<8xf32>
    %38 = vector.multi_reduction <add>, %35, %cst_24 [1] : vector<8x256xf32> to vector<8xf32>
    %39 = vector.shape_cast %38 : vector<8xf32> to vector<8x1xf32>
    %cst_25 = arith.constant 3.906250e-03 : f32
    %40 = vector.broadcast %cst_25 : f32 to vector<8x1xf32>
    %41 = arith.mulf %39, %40 : vector<8x1xf32>
    %42 = vector.broadcast %41 : vector<8x1xf32> to vector<8x256xf32>
    %43 = arith.subf %35, %42 : vector<8x256xf32>
    %44 = arith.mulf %43, %43 : vector<8x256xf32>
    %cst_26 = arith.constant dense<0.000000e+00> : vector<8xf32>
    %45 = vector.multi_reduction <add>, %44, %cst_26 [1] : vector<8x256xf32> to vector<8xf32>
    %46 = vector.shape_cast %45 : vector<8xf32> to vector<8x1xf32>
    %cst_27 = arith.constant 3.906250e-03 : f32
    %47 = vector.broadcast %cst_27 : f32 to vector<8x1xf32>
    %48 = arith.mulf %46, %47 : vector<8x1xf32>
    %cst_28 = arith.constant 9.99999974E-6 : f32
    %49 = vector.broadcast %cst_28 : f32 to vector<8x1xf32>
    %50 = arith.addf %48, %49 : vector<8x1xf32>
    %51 = math.rsqrt %50 : vector<8x1xf32>
    %52 = vector.broadcast %51 : vector<8x1xf32> to vector<8x256xf32>
    %53 = arith.mulf %43, %52 : vector<8x256xf32>
    %54 = vector.broadcast %36 : vector<1x256xf32> to vector<8x256xf32>
    %55 = arith.mulf %53, %54 : vector<8x256xf32>
    %56 = vector.broadcast %37 : vector<1x256xf32> to vector<8x256xf32>
    %57 = arith.addf %55, %56 : vector<8x256xf32>
    %cst_29 = arith.constant 0.000000e+00 : f32
    %58 = vector.broadcast %cst_29 : f32 to vector<8x256xf32>
    %59 = arith.maximumf %57, %58 : vector<8x256xf32>
    %c0_30 = arith.constant 0 : index
    %c0_31 = arith.constant 0 : index
    %60 = vector.load %arg10[%c0_30, %c0_31] : memref<1x256xf32, #tpu.memory_space<vmem>>, vector<1x256xf32>
    %61 = vector.broadcast %60 : vector<1x256xf32> to vector<8x256xf32>
    %62 = arith.mulf %59, %61 : vector<8x256xf32>
    %cst_32 = arith.constant dense<0.000000e+00> : vector<8xf32>
    %63 = vector.multi_reduction <add>, %62, %cst_32 [1] : vector<8x256xf32> to vector<8xf32>
    %64 = vector.shape_cast %63 : vector<8xf32> to vector<8x1xf32>
    %c0_33 = arith.constant 0 : index
    %c0_34 = arith.constant 0 : index
    %65 = vector.load %arg11[%c0_33, %c0_34] : memref<1x256xf32, #tpu.memory_space<vmem>>, vector<1x256xf32>
    %66 = vector.broadcast %65 : vector<1x256xf32> to vector<8x256xf32>
    %67 = arith.mulf %59, %66 : vector<8x256xf32>
    %cst_35 = arith.constant dense<0.000000e+00> : vector<8xf32>
    %68 = vector.multi_reduction <add>, %67, %cst_35 [1] : vector<8x256xf32> to vector<8xf32>
    %69 = vector.shape_cast %68 : vector<8xf32> to vector<8x1xf32>
    %70 = tpu.iota {dimensions = array<i32: 1>} : vector<8x2xi32>
    %c0_i32 = arith.constant 0 : i32
    %71 = vector.broadcast %c0_i32 : i32 to vector<8x2xi32>
    %72 = arith.cmpi eq, %70, %71 : vector<8x2xi32>
    %73 = vector.shape_cast %64 : vector<8x1xf32> to vector<8x1xf32>
    %74 = vector.broadcast %73 : vector<8x1xf32> to vector<8x2xf32>
    %75 = vector.shape_cast %69 : vector<8x1xf32> to vector<8x1xf32>
    %76 = vector.broadcast %75 : vector<8x1xf32> to vector<8x2xf32>
    %77 = arith.select %72, %74, %76 : vector<8x2xi1>, vector<8x2xf32>
    %c0_36 = arith.constant 0 : index
    %c0_37 = arith.constant 0 : index
    %78 = vector.load %arg12[%c0_36, %c0_37] : memref<1x2xf32, #tpu.memory_space<vmem>>, vector<1x2xf32>
    %79 = vector.broadcast %78 : vector<1x2xf32> to vector<8x2xf32>
    %80 = arith.addf %77, %79 : vector<8x2xf32>
    %c0_38 = arith.constant 0 : index
    %c0_39 = arith.constant 0 : index
    %81 = vector.load %arg13[%c0_38, %c0_39] : memref<8x2xf32, #tpu.memory_space<vmem>>, vector<8x2xf32>
    tpu.vector_store %arg13[%c0_38, %c0_39], %80 {strides = array<i32>} : memref<8x2xf32, #tpu.memory_space<vmem>>, vector<8x2xf32>,
    return
  }
  func.func @transform_0(%arg0: i32) -> (i32, i32) {
    %c0_i32 = arith.constant 0 : i32
    %c0_i32_0 = arith.constant 0 : i32
    return %arg0, %c0_i32 : i32, i32
  }
  func.func @transform_1(%arg0: i32) -> (i32, i32) {
    %c0_i32 = arith.constant 0 : i32
    %c0_i32_0 = arith.constant 0 : i32
    %c0_i32_1 = arith.constant 0 : i32
    return %c0_i32, %c0_i32_0 : i32, i32
  }
  func.func @transform_2(%arg0: i32) -> (i32, i32) {
    %c0_i32 = arith.constant 0 : i32
    %c0_i32_0 = arith.constant 0 : i32
    %c0_i32_1 = arith.constant 0 : i32
    return %c0_i32, %c0_i32_0 : i32, i32
  }
  func.func @transform_3(%arg0: i32) -> (i32, i32) {
    %c0_i32 = arith.constant 0 : i32
    %c0_i32_0 = arith.constant 0 : i32
    %c0_i32_1 = arith.constant 0 : i32
    return %c0_i32, %c0_i32_0 : i32, i32
  }
  func.func @transform_4(%arg0: i32) -> (i32, i32) {
    %c0_i32 = arith.constant 0 : i32
    %c0_i32_0 = arith.constant 0 : i32
    %c0_i32_1 = arith.constant 0 : i32
    return %c0_i32, %c0_i32_0 : i32, i32
  }
  func.func @transform_5(%arg0: i32) -> (i32, i32) {
    %c0_i32 = arith.constant 0 : i32
    %c0_i32_0 = arith.constant 0 : i32
    %c0_i32_1 = arith.constant 0 : i32
    return %c0_i32, %c0_i32_0 : i32, i32
  }
  func.func @transform_6(%arg0: i32) -> (i32, i32) {
    %c0_i32 = arith.constant 0 : i32
    %c0_i32_0 = arith.constant 0 : i32
    %c0_i32_1 = arith.constant 0 : i32
    return %c0_i32, %c0_i32_0 : i32, i32
  }
  func.func @transform_7(%arg0: i32) -> (i32, i32) {
    %c0_i32 = arith.constant 0 : i32
    %c0_i32_0 = arith.constant 0 : i32
    %c0_i32_1 = arith.constant 0 : i32
    return %c0_i32, %c0_i32_0 : i32, i32
  }
  func.func @transform_8(%arg0: i32) -> (i32, i32) {
    %c0_i32 = arith.constant 0 : i32
    %c0_i32_0 = arith.constant 0 : i32
    %c0_i32_1 = arith.constant 0 : i32
    return %c0_i32, %c0_i32_0 : i32, i32
  }
  func.func @transform_9(%arg0: i32) -> (i32, i32) {
    %c0_i32 = arith.constant 0 : i32
    %c0_i32_0 = arith.constant 0 : i32
    %c0_i32_1 = arith.constant 0 : i32
    return %c0_i32, %c0_i32_0 : i32, i32
  }
  func.func @transform_10(%arg0: i32) -> (i32, i32) {
    %c0_i32 = arith.constant 0 : i32
    %c0_i32_0 = arith.constant 0 : i32
    %c0_i32_1 = arith.constant 0 : i32
    return %c0_i32, %c0_i32_0 : i32, i32
  }
  func.func @transform_11(%arg0: i32) -> (i32, i32) {
    %c0_i32 = arith.constant 0 : i32
    %c0_i32_0 = arith.constant 0 : i32
    %c0_i32_1 = arith.constant 0 : i32
    return %c0_i32, %c0_i32_0 : i32, i32
  }
  func.func @transform_12(%arg0: i32) -> (i32, i32) {
    %c0_i32 = arith.constant 0 : i32
    %c0_i32_0 = arith.constant 0 : i32
    return %arg0, %c0_i32 : i32, i32
  }
}

</mosaic_0001>

<bundles_post_ra>
// kernel: tpu_custom_call.1
= control target key start
LH: loop header
LB: loop body
LE: loop exit
PB: predicated region body
PF: predicated region fallthrough
CT: control target
= control target key end

     0   :  { %17 = vsyncpa [#allocation3], 0  ;;  %s1073_s0 = inlined_call_operand.hbm [shape: bf16[8,24], index: 0, kind: input, shape index: {}]   ;;  %s1074_s1 = inlined_call_operand.hbm [shape: bf16[24,256], index: 1, kind: input, shape index: {}]   ;;  %s1075_s2 = inlined_call_operand.hbm [shape: f32[1,256], index: 2, kind: input, shape index: {}]   ;;  %s1076_s3 = inlined_call_operand.vmem [shape: f32[1,256], index: 3, kind: input, shape index: {}]   ;;  %s1077_s4 = inlined_call_operand.hbm [shape: f32[1,256], index: 4, kind: input, shape index: {}]   ;;  %s1078_s5 = inlined_call_operand.hbm [shape: bf16[256,256], index: 5, kind: input, shape index: {}]   ;;  %s1079_s6 = inlined_call_operand.vmem [shape: f32[1,256], index: 6, kind: input, shape index: {}]   ;;  %s1080_s7 = inlined_call_operand.vmem [shape: f32[1,256], index: 7, kind: input, shape index: {}]   ;;  %s1081_s8 = inlined_call_operand.hbm [shape: f32[1,256], index: 8, kind: input, shape index: {}]   ;;  %s1082_s9 = inlined_call_operand.vmem [shape: f32[1,256], index: 9, kind: input, shape index: {}]   ;;  %s1083_s10 = inlined_call_operand.hbm [shape: f32[1,256], index: 10, kind: input, shape index: {}]   ;;  %s1084_s11 = inlined_call_operand.vmem [shape: f32[1,2], index: 11, kind: input, shape index: {}]   ;;  %s1085_s12 = inlined_call_operand.vmem [shape: f32[8,2], index: 12, kind: output, shape index: {}]  }
   0x1   :  { %18 = vsyncpa [#allocation5], 0 }
   0x2   :  { %19 = vsyncpa [#allocation8], 0  ;;  %s36_s23 = sshll.u32 %s1074_s1, 4  ;;  %s37_s23 = int_to_ptr.hbm [resolvable:$true] %s36_s23 }
   0x3   :  { %20 = vsyncpa [#allocation11], 0  ;;  %s944_s24 = smov [#allocation4]   ;;  %s63_s28 = sshll.u32 %s1077_s4, 4  ;;  %s64_s28 = int_to_ptr.hbm [resolvable:$true] %s63_s28 }
   0x4   :  { %s38_s25 = sshll.u32 %s944_s24, 4  ;;  %s945_s29 = smov 128   ;;  %s39_s25 = int_to_ptr.vmem [resolvable:$true] %s38_s25 }
   0x5   :  { %s946_s30 = smov 8   ;;  %s947_s13 = smov [#allocation7]  }
   0x6   :  { %44 = dma.hbm_to_vmem [thread:$0]  %s37_s23, 384, %s39_s25, [#allocation5], %s945_s29, %s945_s29, %s946_s30  }
   0x7   :  { %s65_s14 = sshll.u32 %s947_s13, 4  ;;  %s91_s16 = sshll.u32 %s1081_s8, 4  ;;  %s66_s14 = int_to_ptr.vmem [resolvable:$true] %s65_s14  ;;  %s92_s16 = int_to_ptr.hbm [resolvable:$true] %s91_s16 }
   0x8   :  { %68 = dma.hbm_to_vmem [thread:$0]  %s64_s28, 32, %s66_s14, [#allocation8]  }
   0x9   :  { %s26_s4 = sshll.u32 %s1073_s0, 4  ;;  %s948_s19 = smov [#allocation10]   ;;  %s27_s4 = int_to_ptr.hbm [resolvable:$true] %s26_s4 }
   0xa   :  { %s93_s20 = sshll.u32 %s948_s19, 4  ;;  %s949_s21 = smov [#allocation2]   ;;  %s94_s20 = int_to_ptr.vmem [resolvable:$true] %s93_s20 }
   0xb   :  { %96 = dma.hbm_to_vmem [thread:$0]  %s92_s16, 32, %s94_s20, [#allocation11]  }
   0xc   :  { %s28_s22 = sshll.u32 %s949_s21, 4  ;;  %s50_s25 = sshll.u32 %s1075_s2, 4  ;;  %s29_s22 = int_to_ptr.vmem [resolvable:$true] %s28_s22  ;;  %s51_s25 = int_to_ptr.hbm [resolvable:$true] %s50_s25 }
   0xd   :  { %31 = dma.hbm_to_vmem [thread:$0]  %s27_s4, 64, %s29_s22, [#allocation3]  }
   0xe   :  { %s73_s27 = sshll.u32 %s1078_s5, 4  ;;  %s950_s28 = smov [#allocation6]   ;;  %s74_s27 = int_to_ptr.hbm [resolvable:$true] %s73_s27 }
   0xf   :  { %s52_s0 = sshll.u32 %s950_s28, 4  ;;  %s951_s13 = smov [#allocation9]   ;;  %s53_s0 = int_to_ptr.vmem [resolvable:$true] %s52_s0 }
  0x10   :  { %55 = dma.hbm_to_vmem [thread:$0]  %s51_s25, 32, %s53_s0, [#allocation5]  }
  0x11   :  { %s75_s14 = sshll.u32 %s951_s13, 4  ;;  %s104_s16 = sshll.u32 %s1083_s10, 4  ;;  %s76_s14 = int_to_ptr.vmem [resolvable:$true] %s75_s14  ;;  %s105_s16 = int_to_ptr.hbm [resolvable:$true] %s104_s16 }
  0x12   :  { %81 = dma.hbm_to_vmem [thread:$0]  %s74_s27, 4096, %s76_s14, [#allocation8], %s945_s29, %s945_s29, %s946_s30  }
  0x13   :  { %s952_s2 = smov [#allocation12]  }
  0x14   :  { %s106_s17 = sshll.u32 %s952_s2, 4  ;;  %s107_s17 = int_to_ptr.vmem [resolvable:$true] %s106_s17 }
  0x15   :  { %109 = dma.hbm_to_vmem [thread:$0]  %s105_s16, 32, %s107_s17, [#allocation11]  }
  0x16   :  { %936 = dma.done.wait [#allocation3], 64  }
  0x17   :  { %937 = vsyncadd [#allocation3], 4294967232 }
  0x18   :  { %938 = dma.done.wait [#allocation5], 416  }
  0x19   :  { %939 = vsyncadd [#allocation5], 4294966880 }
  0x1a   :  { %940 = dma.done.wait [#allocation8], 4128  }
  0x1b   :  { %941 = vsyncadd [#allocation8], 4294963168 }
  0x1c   :  { %942 = dma.done.wait [#allocation11], 64  }
  0x1d   :  { %943 = vsyncadd [#allocation11], 4294967232  ;;  %v144_v0 = vld [vmem:[#allocation4 + $0x10] sm:$0xff]  ;;  %vm170_vm0 = vcmask 1043456   ;;  %v584_v3 = vld [vmem:[#allocation4] sm:$0xf] }
  0x1e   :  { %v158_v1 = vunpack.c.l.b16 %v144_v0  ;;  %v159_v2 = vunpack.c.h.b16 %v144_v0  ;;  %v721_v6 = vld [vmem:[#allocation4 + $0x4] sm:$0xf0]  ;;  %v720_v7 = vld [vmem:[#allocation4 + $0x4] sm:$0xf]  ;;  %v586_v8 = vld [vmem:[#allocation4 + $0x8] sm:$0xf0] }
  0x1f   :  { %v585_v11 = vor.u32 %v721_v6, %v584_v3  ;;  %v589_v12 = vor.u32 %v720_v7, %v586_v8  ;;  %v141_v13 = vld [vmem:[#allocation2] sm:$0xf]  ;;  %vm166_vm1 = vcmask 195584   ;;  %v145_v14 = vld [vmem:[#allocation6] sm:$0x3]  ;;  %vm572_vm9 = vcmask 15360  }
  0x20   :  { %v162_v4 = vpack.c.b16 %v158_v1, %v158_v1  ;;  %v163_v5 = vpack.c.b16 %v159_v2, %v159_v2  ;;  %v147_v15 = vperm.slane %v145_v14, 0  ;;  %v148_v16 = vperm.slane %v145_v14, 1  ;;  %v650_v31 = vld [vmem:[#allocation9 + $0x70] sm:$0xf]  ;;  %v737_v32 = vld [vmem:[#allocation9 + $0x74] sm:$0xf0] }
  0x21   :  { %v714_v33 = vld [vmem:[#allocation9 + $0xf0] sm:$0xf]  ;;  %v651_v34 = vor.u32 %v737_v32, %v650_v31  ;;  %v753_v35 = vld [vmem:[#allocation9 + $0xf4] sm:$0xf0]  ;;  %v736_v36 = vld [vmem:[#allocation9 + $0x74] sm:$0xf] }
  0x22   :  { %v172_v9 = vsel %vm170_vm0, %v162_v4, 0  ;;  %v175_v10 = vsel %vm170_vm0, %v163_v5, 0  ;;  %v652_v37 = vld [vmem:[#allocation9 + $0x78] sm:$0xf0]  ;;  %v715_v38 = vor.u32 %v753_v35, %v714_v33  ;;  %v752_v40 = vld [vmem:[#allocation9 + $0xf4] sm:$0xf] }
  0x23   :  { %183 = vmatpush.bf16.msra.mxu0 %v172_v9  ;;  %196 = vmatpush.bf16.msra.mxu1 %v175_v10  ;;  %v655_v39 = vor.u32 %v736_v36, %v652_v37  ;;  %v716_v41 = vld [vmem:[#allocation9 + $0xf8] sm:$0xf0]  ;;  %v642_v43 = vld [vmem:[#allocation9 + $0x60] sm:$0xf]  ;;  %v735_v44 = vld [vmem:[#allocation9 + $0x64] sm:$0xf0] }
  0x24   :  { %446 = vmatpush.bf16.msra.mxu2 %v651_v34  ;;  %v719_v42 = vor.u32 %v752_v40, %v716_v41  ;;  %459 = vmatpush.bf16.msra.mxu3 %v715_v38  ;;  %v706_v45 = vld [vmem:[#allocation9 + $0xe0] sm:$0xf]  ;;  %v643_v46 = vor.u32 %v735_v44, %v642_v43  ;;  %v751_v47 = vld [vmem:[#allocation9 + $0xe4] sm:$0xf0]  ;;  %v734_v48 = vld [vmem:[#allocation9 + $0x64] sm:$0xf] }
  0x25   :  { %v644_v49 = vld [vmem:[#allocation9 + $0x68] sm:$0xf0]  ;;  %v707_v50 = vor.u32 %v751_v47, %v706_v45  ;;  %v750_v52 = vld [vmem:[#allocation9 + $0xe4] sm:$0xf]  ;;  %v634_v55 = vld [vmem:[#allocation9 + $0x50] sm:$0xf] }
  0x26   :  { %v647_v51 = vor.u32 %v734_v48, %v644_v49  ;;  %v708_v53 = vld [vmem:[#allocation9 + $0xe8] sm:$0xf0]  ;;  %v733_v56 = vld [vmem:[#allocation9 + $0x54] sm:$0xf0]  ;;  %v698_v57 = vld [vmem:[#allocation9 + $0xd0] sm:$0xf] }
  0x27   :  { %184 = vmatpush.bf16.msra.mxu0 %v585_v11  ;;  %197 = vmatpush.bf16.msra.mxu1 %v589_v12  ;;  %v711_v54 = vor.u32 %v750_v52, %v708_v53  ;;  %v635_v58 = vor.u32 %v733_v56, %v634_v55  ;;  %v749_v59 = vld [vmem:[#allocation9 + $0xd4] sm:$0xf0]  ;;  %v732_v60 = vld [vmem:[#allocation9 + $0x54] sm:$0xf]  ;;  %v636_v61 = vld [vmem:[#allocation9 + $0x58] sm:$0xf0] }
  0x28   :  { %447 = vmatpush.bf16.msra.mxu2 %v643_v46  ;;  %460 = vmatpush.bf16.msra.mxu3 %v707_v50  ;;  %v699_v62 = vor.u32 %v749_v59, %v698_v57  ;;  %v639_v63 = vor.u32 %v732_v60, %v636_v61  ;;  %v748_v0 = vld [vmem:[#allocation9 + $0xd4] sm:$0xf]  ;;  %v700_v1 = vld [vmem:[#allocation9 + $0xd8] sm:$0xf0]  ;;  %v626_v3 = vld [vmem:[#allocation9 + $0x40] sm:$0xf] }
  0x29   :  { %v703_v2 = vor.u32 %v748_v0, %v700_v1  ;;  %v731_v4 = vld [vmem:[#allocation9 + $0x44] sm:$0xf0]  ;;  %v690_v5 = vld [vmem:[#allocation9 + $0xc0] sm:$0xf]  ;;  %v730_v8 = vld [vmem:[#allocation9 + $0x44] sm:$0xf] }
  0x2a   :  { %590 = vmatmul.msk.bf16.vlgmr.msra.gmra.mxu0 %vm166_vm1, %v141_v13  ;;  %591 = vmatmul.msk.bf16.vlgmr.msra.gmra.mxu1 %vm166_vm1, %v141_v13  ;;  %v627_v6 = vor.u32 %v731_v4, %v626_v3  ;;  %v747_v7 = vld [vmem:[#allocation9 + $0xc4] sm:$0xf0]  ;;  %v628_v9 = vld [vmem:[#allocation9 + $0x48] sm:$0xf0]  ;;  %v746_v12 = vld [vmem:[#allocation9 + $0xc4] sm:$0xf] }
  0x2b   :  { %472 = vmatpush.bf16.msrb.mxu0 %v655_v39  ;;  %485 = vmatpush.bf16.msrb.mxu1 %v719_v42  ;;  %v691_v10 = vor.u32 %v747_v7, %v690_v5  ;;  %v631_v11 = vor.u32 %v730_v8, %v628_v9  ;;  %v692_v13 = vld [vmem:[#allocation9 + $0xc8] sm:$0xf0]  ;;  %v674_v31 = vld [vmem:[#allocation9 + $0xa0] sm:$0xf]  ;;  %v743_v33 = vld [vmem:[#allocation9 + $0xa4] sm:$0xf0] }
  0x2c   :  { %448 = vmatpush.bf16.msra.mxu2 %v635_v58  ;;  %461 = vmatpush.bf16.msra.mxu3 %v699_v62  ;;  %v695_v14 = vor.u32 %v746_v12, %v692_v13  ;;  %v726_v34 = vld [vmem:[#allocation9 + $0x24] sm:$0xf]  ;;  %v612_v35 = vld [vmem:[#allocation9 + $0x28] sm:$0xf0]  ;;  %v675_v36 = vor.u32 %v743_v33, %v674_v31  ;;  %v602_v40 = vld [vmem:[#allocation9 + $0x10] sm:$0xf] }
  0x2d   :  { %v615_v37 = vor.u32 %v726_v34, %v612_v35  ;;  %v742_v38 = vld [vmem:[#allocation9 + $0xa4] sm:$0xf]  ;;  %v676_v39 = vld [vmem:[#allocation9 + $0xa8] sm:$0xf0]  ;;  %v725_v42 = vld [vmem:[#allocation9 + $0x14] sm:$0xf0] }
  0x2e   :  { %v679_v41 = vor.u32 %v742_v38, %v676_v39  ;;  %v666_v43 = vld [vmem:[#allocation9 + $0x90] sm:$0xf]  ;;  %v741_v44 = vld [vmem:[#allocation9 + $0x94] sm:$0xf0]  ;;  %v603_v45 = vor.u32 %v725_v42, %v602_v40  ;;  %v724_v47 = vld [vmem:[#allocation9 + $0x14] sm:$0xf] }
  0x2f   :  { %473 = vmatpush.bf16.msrb.mxu0 %v647_v51  ;;  %486 = vmatpush.bf16.msrb.mxu1 %v711_v54  ;;  %v667_v46 = vor.u32 %v741_v44, %v666_v43  ;;  %v604_v48 = vld [vmem:[#allocation9 + $0x18] sm:$0xf0]  ;;  %v740_v49 = vld [vmem:[#allocation9 + $0x94] sm:$0xf]  ;;  %v594_v52 = vld [vmem:[#allocation9] sm:$0xf] }
  0x30   :  { %449 = vmatpush.bf16.msra.mxu2 %v627_v6  ;;  %462 = vmatpush.bf16.msra.mxu3 %v691_v10  ;;  %v607_v50 = vor.u32 %v724_v47, %v604_v48  ;;  %v668_v51 = vld [vmem:[#allocation9 + $0x98] sm:$0xf0]  ;;  %v723_v53 = vld [vmem:[#allocation9 + $0x4] sm:$0xf0]  ;;  %v658_v55 = vld [vmem:[#allocation9 + $0x80] sm:$0xf] }
  0x31   :  { %v671_v54 = vor.u32 %v740_v49, %v668_v51  ;;  %v739_v56 = vld [vmem:[#allocation9 + $0x84] sm:$0xf0]  ;;  %v722_v57 = vld [vmem:[#allocation9 + $0x4] sm:$0xf]  ;;  %v595_v58 = vor.u32 %v723_v53, %v594_v52  ;;  %v596_v59 = vld [vmem:[#allocation9 + $0x8] sm:$0xf0] }
  0x32   :  { %v738_v60 = vld [vmem:[#allocation9 + $0x84] sm:$0xf]  ;;  %v660_v61 = vld [vmem:[#allocation9 + $0x88] sm:$0xf0]  ;;  %v659_v62 = vor.u32 %v739_v56, %v658_v55  ;;  %v203_v9 = vld [vmem:[%s1076_s3] sm:$0x3] }
  0x33   :  { %474 = vmatpush.bf16.msrb.mxu0 %v639_v63  ;;  %487 = vmatpush.bf16.msrb.mxu1 %v703_v2  ;;  %v599_v63 = vor.u32 %v722_v57, %v596_v59  ;;  %v663_v0 = vor.u32 %v738_v60, %v660_v61  ;;  %v231_v12 = vperm.slane %v203_v9, 0  ;;  %v232_v13 = vperm.slane %v203_v9, 1  ;;  %v499_v60 = vld [vmem:[#allocation10] sm:$0x3] }
  0x37   :  { %475 = vmatpush.bf16.msrb.mxu0 %v631_v11  ;;  %488 = vmatpush.bf16.msrb.mxu1 %v695_v14  ;;  %v204_v11 = vld [vmem:[#allocation7] sm:$0x3] }
  0xa7   :  { %v186_v17 = vpop.f32.mrf.mxu0  ;;  %v199_v18 = vpop.f32.mrf.mxu1 }
  0xa8   :  { %v187_v19 = vadd.f32 %v186_v17, %v147_v15  ;;  %v200_v20 = vadd.f32 %v199_v18, %v148_v16  ;;  %v618_v15 = vld [vmem:[#allocation9 + $0x30] sm:$0xf]  ;;  %v729_v16 = vld [vmem:[#allocation9 + $0x34] sm:$0xf0] }
  0xa9   :  { %v682_v17 = vld [vmem:[#allocation9 + $0xb0] sm:$0xf]  ;;  %v619_v18 = vor.u32 %v729_v16, %v618_v15  ;;  %v238_v16 = vperm.slane %v204_v11, 0 }
  0xaa   :  { %v205_v21 = vadd.f32 %v200_v20, %v187_v19 }
  0xab   :  { %450 = vmatpush.bf16.msra.mxu2 %v619_v18  ;;  %v239_v18 = vperm.slane %v204_v11, 1 }
  0xac   :  { %206 = vadd.xlane.f32.xlu0 %v205_v21  ;;  %v620_v21 = vld [vmem:[#allocation9 + $0x38] sm:$0xf0] }
  0xaf   :  { %v188_v22 = vpop.f32.mrf.mxu0  ;;  %v201_v23 = vpop.f32.mrf.mxu1 }
 0x11f   :  { %v207_v24 = vpop.xlane.xlu0 %206 }
 0x120   :  { %v208_v25 = vmul.f32 0.00390625, %v207_v24  ;;  %v744_v24 = vld [vmem:[#allocation9 + $0xb4] sm:$0xf] }
 0x122   :  { %v1045_v26 = vsub.f32 %v187_v19, %v208_v25  ;;  %v1047_v27 = vsub.f32 %v200_v20, %v208_v25  ;;  %v745_v19 = vld [vmem:[#allocation9 + $0xb4] sm:$0xf0]  ;;  %v728_v20 = vld [vmem:[#allocation9 + $0x34] sm:$0xf]  ;;  %v684_v25 = vld [vmem:[#allocation9 + $0xb8] sm:$0xf0] }
 0x123   :  { %v683_v22 = vor.u32 %v745_v19, %v682_v17  ;;  %v623_v23 = vor.u32 %v728_v20, %v620_v21 }
 0x124   :  { %v211_v28 = vmul.f32 %v1045_v26, %v1045_v26  ;;  %v212_v29 = vmul.f32 %v1047_v27, %v1047_v27 }
 0x125   :  { %463 = vmatpush.bf16.msra.mxu3 %v683_v22  ;;  %476 = vmatpush.bf16.msrb.mxu0 %v623_v23 }
 0x126   :  { %v213_v30 = vadd.f32 %v212_v29, %v211_v28  ;;  %v687_v28 = vor.u32 %v744_v24, %v684_v25  ;;  %v610_v29 = vld [vmem:[#allocation9 + $0x20] sm:$0xf] }
 0x128   :  { %214 = vadd.xlane.f32.xlu0 %v213_v30  ;;  %v727_v30 = vld [vmem:[#allocation9 + $0x24] sm:$0xf0]  ;;  %489 = vmatpush.bf16.msrb.mxu1 %v687_v28 }
 0x129   :  { %v611_v32 = vor.u32 %v727_v30, %v610_v29  ;;  %464 = vmatpush.bf16.msra.mxu3 %v675_v36  ;;  %477 = vmatpush.bf16.msrb.mxu0 %v615_v37 }
 0x12b   :  { %451 = vmatpush.bf16.msra.mxu2 %v611_v32 }
 0x12c   :  { %490 = vmatpush.bf16.msrb.mxu1 %v679_v41 }
 0x12d   :  { %465 = vmatpush.bf16.msra.mxu3 %v667_v46  ;;  %478 = vmatpush.bf16.msrb.mxu0 %v607_v50 }
 0x12f   :  { %452 = vmatpush.bf16.msra.mxu2 %v603_v45 }
 0x130   :  { %491 = vmatpush.bf16.msrb.mxu1 %v671_v54 }
 0x131   :  { %466 = vmatpush.bf16.msra.mxu3 %v659_v62  ;;  %479 = vmatpush.bf16.msrb.mxu0 %v599_v63 }
 0x133   :  { %453 = vmatpush.bf16.msra.mxu2 %v595_v58  ;;  %v498_v58 = vld [vmem:[%s1080_s7] sm:$0x3] }
 0x134   :  { %492 = vmatpush.bf16.msrb.mxu1 %v663_v0  ;;  %v526_v61 = vperm.slane %v498_v58, 0  ;;  %v527_v62 = vperm.slane %v498_v58, 1 }
 0x19b   :  { %v215_v1 = vpop.xlane.xlu0 %214 }
 0x19c   :  { %v216_v2 = vmul.f32 0.00390625, %v215_v1 }
 0x19e   :  { %v217_v3 = vadd.f32 1e-05, %v216_v2  ;;  %v533_v2 = vperm.slane %v499_v60, 0 }
 0x1a0   :  { %764 = vrsqrt.f32 %v217_v3  ;;  %vm224_vm3 = vweird.f32 %v217_v3 }
 0x1a6   :  { %v765_v4 = vpop.eup %764 }
 0x1a7   :  { %v219_v5 = vmul.f32 %v765_v4, %v217_v3  ;;  %vm225_vm2 = vweird.f32 %v765_v4  ;;  %v534_v3 = vperm.slane %v499_v60, 1 }
 0x1a8   :  { %vm226_vm4 = vmor %vm224_vm3, %vm225_vm2 }
 0x1a9   :  { %v220_v6 = vmul.f32 %v765_v4, %v219_v5 }
 0x1ab   :  { %v221_v7 = vmul.f32 0.5, %v220_v6 }
 0x1ad   :  { %v222_v8 = vsub.f32 1.5, %v221_v7 }
 0x1af   :  { %v223_v10 = vmul.f32 %v765_v4, %v222_v8 }
 0x1b1   :  { %v227_v14 = vsel %vm226_vm4, %v765_v4, %v223_v10  ;;  %v541_v4 = vld [vmem:[%s1082_s9] sm:$0x3] }
 0x1b2   :  { %v228_v15 = vmul.f32 %v227_v14, %v1045_v26  ;;  %v229_v17 = vmul.f32 %v227_v14, %v1047_v27  ;;  %v280_v26 = vld [vmem:[%s1079_s6] sm:$0x3]  ;;  %v543_v9 = vperm.slane %v541_v4, 0  ;;  %v544_v10 = vperm.slane %v541_v4, 1 }
 0x1b3   :  { %v283_v29 = vperm.slane %v280_v26, 1  ;;  %v282_v31 = vperm.slane %v280_v26, 0 }
 0x1b4   :  { %v235_v19 = vmul.f32 %v231_v12, %v228_v15  ;;  %v236_v20 = vmul.f32 %v232_v13, %v229_v17  ;;  %v552_v13 = vld [vmem:[#allocation12] sm:$0x3] }
 0x1b5   :  { %v554_v17 = vperm.slane %v552_v13, 0 }
 0x1b6   :  { %v242_v21 = vadd.f32 %v238_v16, %v235_v19  ;;  %v243_v22 = vadd.f32 %v239_v18, %v236_v20  ;;  %v555_v18 = vperm.slane %v552_v13, 1 }
 0x1b8   :  { %v244_v23 = vmax.f32 %v242_v21, 0.0  ;;  %v245_v24 = vmax.f32 %v243_v22, 0.0  ;;  %v563_v22 = vlaneseq }
 0x1ba   :  { %v246_v25 = vpack.c.bf16 %v244_v23, %v244_v23  ;;  %v247_v28 = vpack.c.bf16 %v245_v24, %v245_v24  ;;  %v564_v24 = vand.u32 127, %v563_v22 }
 0x1bc   :  { %454 = vmatmul.bf16.vlgmr.msra.gmra.mxu2 %v246_v25  ;;  %467 = vmatmul.bf16.vlgmr.msra.gmra.mxu3 %v247_v28  ;;  %vm565_vm8 = vcmp.eq.s32.totalorder %v564_v24, 0 }
 0x1bd   :  { %480 = vmatmul.bf16.vlgmr.msrb.gmra.mxu0 %v246_v25  ;;  %493 = vmatmul.bf16.vlgmr.msrb.gmra.mxu1 %v247_v28  ;;  %v763_v25 = vld [vmem:[%s1084_s11] ss:$0 sm:$0xff] }
 0x23a   :  { %v481_v30 = vpop.f32.mrf.mxu0  ;;  %v494_v27 = vpop.f32.mrf.mxu1 }
 0x23b   :  { %v482_v32 = vadd.f32 %v481_v30, %v283_v29 }
 0x23d   :  { %v495_v36 = vadd.f32 %v494_v27, %v482_v32 }
 0x23f   :  { %v455_v33 = vpop.f32.mrf.mxu2  ;;  %v468_v34 = vpop.f32.mrf.mxu3 }
 0x240   :  { %v456_v35 = vadd.f32 %v455_v33, %v282_v31 }
 0x242   :  { %v469_v37 = vadd.f32 %v468_v34, %v456_v35  ;;  %v483_v38 = vpop.f32.mrf.mxu0  ;;  %v496_v39 = vpop.f32.mrf.mxu1 }
 0x244   :  { %v500_v40 = vadd.f32 %v495_v36, %v469_v37 }
 0x246   :  { %501 = vadd.xlane.f32.xlu1 %v500_v40 }
 0x247   :  { %v457_v41 = vpop.f32.mrf.mxu2  ;;  %v470_v42 = vpop.f32.mrf.mxu3 }
 0x2b9   :  { %v502_v43 = vpop.xlane.xlu1 %501 }
 0x2ba   :  { %v503_v44 = vmul.f32 0.00390625, %v502_v43 }
 0x2bc   :  { %v504_v45 = vsub.f32 %v469_v37, %v503_v44  ;;  %v505_v46 = vsub.f32 %v495_v36, %v503_v44 }
 0x2be   :  { %v506_v47 = vmul.f32 %v504_v45, %v504_v45  ;;  %v507_v48 = vmul.f32 %v505_v46, %v505_v46 }
 0x2c0   :  { %v508_v49 = vadd.f32 %v507_v48, %v506_v47 }
 0x2c2   :  { %509 = vadd.xlane.f32.xlu1 %v508_v49 }
 0x335   :  { %v510_v50 = vpop.xlane.xlu1 %509 }
 0x336   :  { %v511_v51 = vmul.f32 0.00390625, %v510_v50 }
 0x338   :  { %v512_v52 = vadd.f32 1e-05, %v511_v51 }
 0x33a   :  { %766 = vrsqrt.f32 %v512_v52  ;;  %vm519_vm6 = vweird.f32 %v512_v52 }
 0x340   :  { %v767_v53 = vpop.eup %766 }
 0x341   :  { %v514_v54 = vmul.f32 %v767_v53, %v512_v52  ;;  %vm520_vm5 = vweird.f32 %v767_v53 }
 0x342   :  { %vm521_vm7 = vmor %vm519_vm6, %vm520_vm5 }
 0x343   :  { %v515_v55 = vmul.f32 %v767_v53, %v514_v54 }
 0x345   :  { %v516_v56 = vmul.f32 0.5, %v515_v55 }
 0x347   :  { %v517_v57 = vsub.f32 1.5, %v516_v56 }
 0x349   :  { %v518_v59 = vmul.f32 %v767_v53, %v517_v57 }
 0x34b   :  { %v522_v63 = vsel %vm521_vm7, %v767_v53, %v518_v59 }
 0x34c   :  { %v523_v0 = vmul.f32 %v522_v63, %v504_v45  ;;  %v524_v1 = vmul.f32 %v522_v63, %v505_v46 }
 0x34e   :  { %v530_v5 = vmul.f32 %v526_v61, %v523_v0  ;;  %v531_v6 = vmul.f32 %v527_v62, %v524_v1 }
 0x350   :  { %v537_v7 = vadd.f32 %v533_v2, %v530_v5  ;;  %v538_v8 = vadd.f32 %v534_v3, %v531_v6 }
 0x352   :  { %v539_v11 = vmax.f32 %v537_v7, 0.0  ;;  %v540_v12 = vmax.f32 %v538_v8, 0.0 }
 0x354   :  { %v547_v14 = vmul.f32 %v543_v9, %v539_v11  ;;  %v548_v15 = vmul.f32 %v544_v10, %v540_v12  ;;  %v558_v19 = vmul.f32 %v554_v17, %v539_v11  ;;  %v559_v20 = vmul.f32 %v555_v18, %v540_v12 }
 0x356   :  { %v549_v16 = vadd.f32 %v548_v15, %v547_v14  ;;  %v560_v21 = vadd.f32 %v559_v20, %v558_v19 }
 0x358   :  { %550 = vadd.xlane.f32.xlu2 %v549_v16 }
 0x360   :  { %561 = vadd.xlane.f32.xlu2 %v560_v21 }
 0x3cb   :  { %v551_v23 = vpop.xlane.xlu2 %550 }
 0x3d3   :  { %v562_v28 = vpop.xlane.xlu2 %561 }
 0x3d4   :  { %v566_v26 = vsel %vm565_vm8, %v551_v23, %v562_v28 }
 0x3d5   :  { %v571_v29 = vadd.f32 %v763_v25, %v566_v26 }
 0x3d7   :  { %573 = vst.msk [vmem:[%s1085_s12] sm:$0xff] %vm572_vm9, %v571_v29 }
 0x3d8   :  { %578 = vsyncpa [#allocation3], 1 }
 0x3d9   :  { %579 = vsyncpa [#allocation5], 1 }
 0x3da   :  { %580 = vsyncpa [#allocation8], 1 }
 0x3db   :  { %581 = vsyncpa [#allocation11], 1 }

</bundles_post_ra>
